<compile_context>
chip_gen: v7x
topology: tpu7x:2x2x1
jax: 0.10.0
libtpu: 0.0.40
codegen_flags: <defaults>
</compile_context>

<pallas_src>
import jax
import jax.numpy as jnp
from jax.experimental import pallas as pl
from jax.experimental.pallas import tpu as pltpu

INPUT_SIZE = 63
IN_PAD = 64                      # lane-friendly padded input width
H1, H2, H3 = 256, 128, 64
N_HEADS = 4
HEAD_OUT = 6
HEAD_TOTAL = N_HEADS * HEAD_OUT  # 24
OUT_PAD = 128                    # lane-dense padded fused-head output width
MAX_TB = 2048                    # max batch-tile rows (fits scoped VMEM on v5e/v6e/v7x)
MIN_SPLIT_B = 512                # force >=2 tiles (v7x 2nd TC) once tiles stay >=256 rows

HEAD_NAMES = ('vocal_cord', 'contact', 'larynx', 'strength')


def _round_up(n, m):
    return (n + m - 1) // m * m


def _mlp_kernel(x_ref,
                w1_ref, b1_ref,
                w2_ref, b2_ref,
                w3_ref, b3_ref,
                wh_ref, bh_ref,
                out_ref):
    # Matmul-operand dtype is whatever the weights/input are stored in (bf16 on the
    # production path, f32 for the validation path). Accumulation is always f32.
    cdt = w1_ref.dtype
    x = x_ref[...]                                               # [TB, 64], already cdt

    # shared layer 1: Linear(64 -> 256) + ReLU  (Dropout(0.3) == identity in eval)
    h1 = jnp.dot(x, w1_ref[...], preferred_element_type=jnp.float32) + b1_ref[...]
    h1 = jnp.maximum(h1, 0.0)

    # shared layer 2: Linear(256 -> 128) + ReLU (Dropout(0.2) == identity in eval)
    h2 = jnp.dot(h1.astype(cdt), w2_ref[...],
                 preferred_element_type=jnp.float32) + b2_ref[...]
    h2 = jnp.maximum(h2, 0.0)

    # shared layer 3: Linear(128 -> 64) + ReLU
    h3 = jnp.dot(h2.astype(cdt), w3_ref[...],
                 preferred_element_type=jnp.float32) + b3_ref[...]
    h3 = jnp.maximum(h3, 0.0)

    # fused heads: Linear(64 -> 24), zero-padded to 128 lanes for dense stores.
    out = jnp.dot(h3.astype(cdt), wh_ref[...],
                  preferred_element_type=jnp.float32) + bh_ref[...]
    out_ref[...] = out.astype(out_ref.dtype)                     # single cast at store


def voice_analysis_forward(x, kparams):
    """x: [B, 63] float32, kparams: output of pack_params.

    Returns a dict of 4 [B, 6] float32 arrays (same interface as the PyTorch model).
    """
    B = x.shape[0]
    w1, b1, w2, b2, w3, b3, wh, bh = kparams
    cdt = w1.dtype                      # compute / I-O dtype (bf16 default, f32 supported)
    io_bytes = jnp.dtype(cdt).itemsize

    # Near-equal tile split: caps padding waste at <8 rows + one tile's alignment,
    # and guarantees >=2 tiles for mid/large batches so v7x can shard the batch axis.
    n_tiles = pl.cdiv(B, MAX_TB)
    if B >= MIN_SPLIT_B:
        n_tiles = max(n_tiles, 2)
    TB = min(MAX_TB, _round_up(pl.cdiv(B, n_tiles), 8))
    Bp = _round_up(B, TB)

    # Pad batch to a tile multiple, features 63 -> 64, and cast to the compute dtype
    # on the host (halves input DMA on the bf16 path; zeros are inert).
    xp = jnp.zeros((Bp, IN_PAD), cdt).at[:B, :INPUT_SIZE].set(x.astype(cdt))

    def _tiled(width):
        return pl.BlockSpec((TB, width), lambda i: (i, 0))

    def _pinned(arr):
        return pl.BlockSpec(arr.shape, lambda i: (0, 0))

    flops = 2 * Bp * (IN_PAD * H1 + H1 * H2 + H2 * H3 + H3 * OUT_PAD)
    weight_bytes = sum(int(t.size) * t.dtype.itemsize
                       for t in (w1, b1, w2, b2, w3, b3, wh, bh))
    bytes_accessed = Bp * (IN_PAD + OUT_PAD) * io_bytes + weight_bytes

    fused = pl.pallas_call(
        _mlp_kernel,
        out_shape=jax.ShapeDtypeStruct((Bp, OUT_PAD), cdt),
        grid=(Bp // TB,),
        in_specs=[
            _tiled(IN_PAD),     # x tile, streamed per grid step
            _pinned(w1), _pinned(b1),
            _pinned(w2), _pinned(b2),
            _pinned(w3), _pinned(b3),
            _pinned(wh), _pinned(bh),
        ],
        out_specs=_tiled(OUT_PAD),
        compiler_params=pltpu.CompilerParams(
            dimension_semantics=("parallel",),
            vmem_limit_bytes=32 * 1024 * 1024),   # keeps v5e on the same large-tile plan
        cost_estimate=pl.CostEstimate(flops=flops, transcendentals=0,
                                      bytes_accessed=bytes_accessed),
    )(xp, w1, b1, w2, b2, w3, b3, wh, bh)

    # Slice the padded output ONCE, cast back to f32 once, then split the small
    # [B, 4, 6] array into heads (no repeated strided reads of the [Bp, 128] slab).
    heads = fused[:B, :HEAD_TOTAL].astype(jnp.float32).reshape(B, N_HEADS, HEAD_OUT)
    return {name: heads[:, k, :] for k, name in enumerate(HEAD_NAMES)}


def pack_params(params, compute_dtype=jnp.bfloat16):
    """Pad / fuse / cast the logical parameters into kernel-friendly form.

    Weights stored [in, out] (already transposed vs PyTorch), input dim padded
    63 -> 64, the 4 heads fused and padded 24 -> 128 output lanes. Weights are
    cast to `compute_dtype` (bf16 by default); biases stay f32 (added to the
    f32 accumulator).
    """
    w1 = jnp.zeros((IN_PAD, H1), jnp.float32).at[:INPUT_SIZE, :].set(params['w1'])

    wh = jnp.concatenate([params[f'w_{n}'] for n in HEAD_NAMES], axis=1)   # [64, 24]
    wh = jnp.zeros((H3, OUT_PAD), jnp.float32).at[:, :HEAD_TOTAL].set(wh)  # [64, 128]
    bh = jnp.concatenate([params[f'b_{n}'] for n in HEAD_NAMES], axis=0)   # [24]
    bh = jnp.zeros((OUT_PAD,), jnp.float32).at[:HEAD_TOTAL].set(bh)        # [128]

    cd = compute_dtype
    return (w1.astype(cd), params['b1'].reshape(1, H1).astype(jnp.float32),
            params['w2'].astype(cd), params['b2'].reshape(1, H2).astype(jnp.float32),
            params['w3'].astype(cd), params['b3'].reshape(1, H3).astype(jnp.float32),
            wh.astype(cd), bh.reshape(1, OUT_PAD).astype(jnp.float32))


def init_params(key):
    """PyTorch-style init: each Linear's weight and bias ~ U(-1/sqrt(fan_in), +)."""
    ks = jax.random.split(key, 14)

    def linear(kw, kb, fan_in, fan_out):
        bound = 1.0 / jnp.sqrt(jnp.float32(fan_in))
        w = jax.random.uniform(kw, (fan_in, fan_out), jnp.float32, -bound, bound)
        b = jax.random.uniform(kb, (fan_out,), jnp.float32, -bound, bound)
        return w, b

    p = {}
    p['w1'], p['b1'] = linear(ks[0], ks[1], INPUT_SIZE, H1)
    p['w2'], p['b2'] = linear(ks[2], ks[3], H1, H2)
    p['w3'], p['b3'] = linear(ks[4], ks[5], H2, H3)
    for i, name in enumerate(HEAD_NAMES):
        p[f'w_{name}'], p[f'b_{name}'] = linear(ks[6 + 2 * i], ks[7 + 2 * i],
                                                H3, HEAD_OUT)
    return p


def reference_forward(x, params):
    """Pure-JAX f32 reference (eval-mode: dropout == identity)."""
    h = jnp.maximum(x @ params['w1'] + params['b1'], 0.0)
    h = jnp.maximum(h @ params['w2'] + params['b2'], 0.0)
    h = jnp.maximum(h @ params['w3'] + params['b3'], 0.0)
    return {n: h @ params[f'w_{n}'] + params[f'b_{n}'] for n in HEAD_NAMES}


if __name__ == "__main__":
    key = jax.random.PRNGKey(0)
    k_params, k_x = jax.random.split(key)

    params = init_params(k_params)
    batch = 8
    x = jax.random.normal(k_x, (batch, INPUT_SIZE), jnp.float32)

    ref = reference_forward(x, params)
    fwd = jax.jit(voice_analysis_forward)

    # 1) f32 matmul operands + f32 I/O: tight check against the f32 reference.
    kp_f32 = pack_params(params, compute_dtype=jnp.float32)
    out_f32 = fwd(x, kp_f32)
    jax.block_until_ready(out_f32)
    for name in HEAD_NAMES:
        assert out_f32[name].shape == (batch, HEAD_OUT), out_f32[name].shape
        assert jnp.allclose(out_f32[name], ref[name], atol=1e-4, rtol=1e-4), name

    # 2) bf16 operands + bf16 I/O with f32 accumulation (default fast path): looser check.
    kp_bf16 = pack_params(params, compute_dtype=jnp.bfloat16)
    out_bf16 = fwd(x, kp_bf16)
    jax.block_until_ready(out_bf16)
    for name in HEAD_NAMES:
        assert out_bf16[name].shape == (batch, HEAD_OUT), out_bf16[name].shape
        assert jnp.allclose(out_bf16[name], ref[name], atol=5e-2, rtol=5e-2), name

    print("KERNEL_OK")
</pallas_src>

<mosaic_0001>
module attributes {stable_mosaic.version = 11 : i64} {
  func.func @_mlp_kernel(%arg0: i32, %arg1: memref<8x64xf32, #tpu.memory_space<vmem>>, %arg2: memref<64x256xf32, #tpu.memory_space<vmem>>, %arg3: memref<1x256xf32, #tpu.memory_space<vmem>>, %arg4: memref<256x128xf32, #tpu.memory_space<vmem>>, %arg5: memref<1x128xf32, #tpu.memory_space<vmem>>, %arg6: memref<128x64xf32, #tpu.memory_space<vmem>>, %arg7: memref<1x64xf32, #tpu.memory_space<vmem>>, %arg8: memref<64x128xf32, #tpu.memory_space<vmem>>, %arg9: memref<1x128xf32, #tpu.memory_space<vmem>>, %arg10: memref<8x128xf32, #tpu.memory_space<vmem>>) attributes {dimension_semantics = [#tpu.dimension_semantics<parallel>], iteration_bounds = array<i64: 1>, scalar_prefetch = 0 : i64, scratch_operands = 0 : i64, tpu.core_type = #tpu.core_type<tc>, window_params = [{transform_indices = @transform_0, window_bounds = array<i64: 8, 64>}, {pipeline_mode = #tpu.pipeline_mode<synchronous>, transform_indices = @transform_1, window_bounds = array<i64: 64, 256>}, {pipeline_mode = #tpu.pipeline_mode<synchronous>, transform_indices = @transform_2, window_bounds = array<i64: 1, 256>}, {pipeline_mode = #tpu.pipeline_mode<synchronous>, transform_indices = @transform_3, window_bounds = array<i64: 256, 128>}, {pipeline_mode = #tpu.pipeline_mode<synchronous>, transform_indices = @transform_4, window_bounds = array<i64: 1, 128>}, {pipeline_mode = #tpu.pipeline_mode<synchronous>, transform_indices = @transform_5, window_bounds = array<i64: 128, 64>}, {pipeline_mode = #tpu.pipeline_mode<synchronous>, transform_indices = @transform_6, window_bounds = array<i64: 1, 64>}, {pipeline_mode = #tpu.pipeline_mode<synchronous>, transform_indices = @transform_7, window_bounds = array<i64: 64, 128>}, {pipeline_mode = #tpu.pipeline_mode<synchronous>, transform_indices = @transform_8, window_bounds = array<i64: 1, 128>}, {transform_indices = @transform_9, window_bounds = array<i64: 8, 128>}]} {
    %c0 = arith.constant 0 : index
    %c0_0 = arith.constant 0 : index
    %0 = vector.load %arg1[%c0, %c0_0] : memref<8x64xf32, #tpu.memory_space<vmem>>, vector<8x64xf32>
    %c0_1 = arith.constant 0 : index
    %c0_2 = arith.constant 0 : index
    %1 = vector.load %arg2[%c0_1, %c0_2] : memref<64x256xf32, #tpu.memory_space<vmem>>, vector<64x256xf32>
    %cst = arith.constant dense<0.000000e+00> : vector<8x256xf32>
    %2 = tpu.matmul %0, %1, %cst {dimension_numbers = #tpu.dot_dimension_numbers<[1], [0], [0], [1], [0, 0, 1, 1], [], []>} : vector<8x64xf32>, vector<64x256xf32>, vector<8x256xf32> -> vector<8x256xf32>
    %c0_3 = arith.constant 0 : index
    %c0_4 = arith.constant 0 : index
    %3 = vector.load %arg3[%c0_3, %c0_4] : memref<1x256xf32, #tpu.memory_space<vmem>>, vector<1x256xf32>
    %4 = vector.broadcast %3 : vector<1x256xf32> to vector<8x256xf32>
    %5 = arith.addf %2, %4 : vector<8x256xf32>
    %cst_5 = arith.constant 0.000000e+00 : f32
    %6 = vector.broadcast %cst_5 : f32 to vector<8x256xf32>
    %7 = arith.maximumf %5, %6 : vector<8x256xf32>
    %c0_6 = arith.constant 0 : index
    %c0_7 = arith.constant 0 : index
    %8 = vector.load %arg4[%c0_6, %c0_7] : memref<256x128xf32, #tpu.memory_space<vmem>>, vector<256x128xf32>
    %cst_8 = arith.constant dense<0.000000e+00> : vector<8x128xf32>
    %9 = tpu.matmul %7, %8, %cst_8 {dimension_numbers = #tpu.dot_dimension_numbers<[1], [0], [0], [1], [0, 0, 1, 1], [], []>} : vector<8x256xf32>, vector<256x128xf32>, vector<8x128xf32> -> vector<8x128xf32>
    %c0_9 = arith.constant 0 : index
    %c0_10 = arith.constant 0 : index
    %10 = vector.load %arg5[%c0_9, %c0_10] : memref<1x128xf32, #tpu.memory_space<vmem>>, vector<1x128xf32>
    %11 = vector.broadcast %10 : vector<1x128xf32> to vector<8x128xf32>
    %12 = arith.addf %9, %11 : vector<8x128xf32>
    %cst_11 = arith.constant 0.000000e+00 : f32
    %13 = vector.broadcast %cst_11 : f32 to vector<8x128xf32>
    %14 = arith.maximumf %12, %13 : vector<8x128xf32>
    %c0_12 = arith.constant 0 : index
    %c0_13 = arith.constant 0 : index
    %15 = vector.load %arg6[%c0_12, %c0_13] : memref<128x64xf32, #tpu.memory_space<vmem>>, vector<128x64xf32>
    %cst_14 = arith.constant dense<0.000000e+00> : vector<8x64xf32>
    %16 = tpu.matmul %14, %15, %cst_14 {dimension_numbers = #tpu.dot_dimension_numbers<[1], [0], [0], [1], [0, 0, 1, 1], [], []>} : vector<8x128xf32>, vector<128x64xf32>, vector<8x64xf32> -> vector<8x64xf32>
    %c0_15 = arith.constant 0 : index
    %c0_16 = arith.constant 0 : index
    %17 = vector.load %arg7[%c0_15, %c0_16] : memref<1x64xf32, #tpu.memory_space<vmem>>, vector<1x64xf32>
    %18 = vector.broadcast %17 : vector<1x64xf32> to vector<8x64xf32>
    %19 = arith.addf %16, %18 : vector<8x64xf32>
    %cst_17 = arith.constant 0.000000e+00 : f32
    %20 = vector.broadcast %cst_17 : f32 to vector<8x64xf32>
    %21 = arith.maximumf %19, %20 : vector<8x64xf32>
    %c0_18 = arith.constant 0 : index
    %c0_19 = arith.constant 0 : index
    %22 = vector.load %arg8[%c0_18, %c0_19] : memref<64x128xf32, #tpu.memory_space<vmem>>, vector<64x128xf32>
    %cst_20 = arith.constant dense<0.000000e+00> : vector<8x128xf32>
    %23 = tpu.matmul %21, %22, %cst_20 {dimension_numbers = #tpu.dot_dimension_numbers<[1], [0], [0], [1], [0, 0, 1, 1], [], []>} : vector<8x64xf32>, vector<64x128xf32>, vector<8x128xf32> -> vector<8x128xf32>
    %c0_21 = arith.constant 0 : index
    %c0_22 = arith.constant 0 : index
    %24 = vector.load %arg9[%c0_21, %c0_22] : memref<1x128xf32, #tpu.memory_space<vmem>>, vector<1x128xf32>
    %25 = vector.broadcast %24 : vector<1x128xf32> to vector<8x128xf32>
    %26 = arith.addf %23, %25 : vector<8x128xf32>
    %c0_23 = arith.constant 0 : index
    %c0_24 = arith.constant 0 : index
    %27 = vector.load %arg10[%c0_23, %c0_24] : memref<8x128xf32, #tpu.memory_space<vmem>>, vector<8x128xf32>
    tpu.vector_store %arg10[%c0_23, %c0_24], %26 {strides = array<i32>} : memref<8x128xf32, #tpu.memory_space<vmem>>, vector<8x128xf32>,
    return
  }
  func.func @transform_0(%arg0: i32) -> (i32, i32) {
    %c0_i32 = arith.constant 0 : i32
    %c0_i32_0 = arith.constant 0 : i32
    return %arg0, %c0_i32 : i32, i32
  }
  func.func @transform_1(%arg0: i32) -> (i32, i32) {
    %c0_i32 = arith.constant 0 : i32
    %c0_i32_0 = arith.constant 0 : i32
    %c0_i32_1 = arith.constant 0 : i32
    return %c0_i32, %c0_i32_0 : i32, i32
  }
  func.func @transform_2(%arg0: i32) -> (i32, i32) {
    %c0_i32 = arith.constant 0 : i32
    %c0_i32_0 = arith.constant 0 : i32
    %c0_i32_1 = arith.constant 0 : i32
    return %c0_i32, %c0_i32_0 : i32, i32
  }
  func.func @transform_3(%arg0: i32) -> (i32, i32) {
    %c0_i32 = arith.constant 0 : i32
    %c0_i32_0 = arith.constant 0 : i32
    %c0_i32_1 = arith.constant 0 : i32
    return %c0_i32, %c0_i32_0 : i32, i32
  }
  func.func @transform_4(%arg0: i32) -> (i32, i32) {
    %c0_i32 = arith.constant 0 : i32
    %c0_i32_0 = arith.constant 0 : i32
    %c0_i32_1 = arith.constant 0 : i32
    return %c0_i32, %c0_i32_0 : i32, i32
  }
  func.func @transform_5(%arg0: i32) -> (i32, i32) {
    %c0_i32 = arith.constant 0 : i32
    %c0_i32_0 = arith.constant 0 : i32
    %c0_i32_1 = arith.constant 0 : i32
    return %c0_i32, %c0_i32_0 : i32, i32
  }
  func.func @transform_6(%arg0: i32) -> (i32, i32) {
    %c0_i32 = arith.constant 0 : i32
    %c0_i32_0 = arith.constant 0 : i32
    %c0_i32_1 = arith.constant 0 : i32
    return %c0_i32, %c0_i32_0 : i32, i32
  }
  func.func @transform_7(%arg0: i32) -> (i32, i32) {
    %c0_i32 = arith.constant 0 : i32
    %c0_i32_0 = arith.constant 0 : i32
    %c0_i32_1 = arith.constant 0 : i32
    return %c0_i32, %c0_i32_0 : i32, i32
  }
  func.func @transform_8(%arg0: i32) -> (i32, i32) {
    %c0_i32 = arith.constant 0 : i32
    %c0_i32_0 = arith.constant 0 : i32
    %c0_i32_1 = arith.constant 0 : i32
    return %c0_i32, %c0_i32_0 : i32, i32
  }
  func.func @transform_9(%arg0: i32) -> (i32, i32) {
    %c0_i32 = arith.constant 0 : i32
    %c0_i32_0 = arith.constant 0 : i32
    return %arg0, %c0_i32 : i32, i32
  }
}

</mosaic_0001>

<bundles_post_ra>
// kernel: voice_analysis_forward.1
= control target key start
LH: loop header
LB: loop body
LE: loop exit
PB: predicated region body
PF: predicated region fallthrough
CT: control target
= control target key end

     0   :  { %14 = vsyncpa [#allocation3], 0  ;;  %s684_s30 = smov [#allocation2]   ;;  %s907_s0 = inlined_call_operand.vmem [shape: f32[8,64], index: 0, kind: input, shape index: {}]   ;;  %s908_s1 = inlined_call_operand.vmem [shape: f32[64,256], index: 1, kind: input, shape index: {}]   ;;  %s909_s2 = inlined_call_operand.vmem [shape: f32[1,256], index: 2, kind: input, shape index: {}]   ;;  %s910_s3 = inlined_call_operand.hbm [shape: f32[256,128], index: 3, kind: input, shape index: {}]   ;;  %s911_s4 = inlined_call_operand.vmem [shape: f32[1,128], index: 4, kind: input, shape index: {}]   ;;  %s912_s5 = inlined_call_operand.vmem [shape: f32[128,64], index: 5, kind: input, shape index: {}]   ;;  %s913_s6 = inlined_call_operand.vmem [shape: f32[1,64], index: 6, kind: input, shape index: {}]   ;;  %s914_s7 = inlined_call_operand.vmem [shape: f32[64,128], index: 7, kind: input, shape index: {}]   ;;  %s915_s8 = inlined_call_operand.vmem [shape: f32[1,128], index: 8, kind: input, shape index: {}]   ;;  %s916_s9 = inlined_call_operand.vmem [shape: f32[8,128], index: 9, kind: output, shape index: {}]  }
   0x1   :  { %s26_s10 = sshll.u32 %s684_s30, 4  ;;  %s660_s13 = scalar_lea.hbm %s910_s3, 4096  ;;  %s27_s10 = int_to_ptr.vmem [resolvable:$true] %s26_s10 }
   0x2   :  { %p661_p0 = scmp.ne.s32.totalorder %s910_s3, %s660_s13  ;;  %p664_p1 = scmp.lt.u32.totalorder %s660_s13, %s910_s3 }
   0x4   :  { %p666_p2 = pnand %p664_p1, %p661_p0 }
   0x6   :  { %669 = shalt.err (!%p666_p2)
}
   0x7   :  { %s670_s18 = scalar_lea.vmem %s27_s10, 4096  ;;  %p675_p4 = scmp.lt.s32.totalorder %s27_s10, %s27_s10 }
   0x8   :  { %p671_p3 = scmp.ne.s32.totalorder %s27_s10, %s670_s18  ;;  %p676_p5 = scmp.lt.s32.totalorder %s670_s18, %s670_s18 }
   0xa   :  { %p677_p6 = por %p676_p5, %p675_p4 }
   0xc   :  { %p678_p7 = pnand %p677_p6, %p671_p3 }
   0xe   :  { %681 = shalt.err (!%p678_p7)
}
   0xf   :  { %s685_s19 = smov 128   ;;  %s686_s20 = smov 8  }
  0x10   :  { %32 = dma.hbm_to_vmem [thread:$0]  %s910_s3, 4096, %s27_s10, [#allocation3], %s685_s19, %s685_s19, %s686_s20  }
  0x11   :  { %682 = dma.done.wait [#allocation3], 4096  }
  0x12   :  { %683 = vsyncadd [#allocation3], 4294963200  ;;  %v687_v0 = vmov 0.0   ;;  %v48_v1 = vld [vmem:[%s908_s1 + $0x8] sm:$0xff]  ;;  %v50_v2 = vld [vmem:[%s908_s1 + $0x18] sm:$0xff]  ;;  %vm75_vm0 = vcmask 523264  }
  0x13   :  { %143 = vmatprep.mubr.f32.mxu0 %v687_v0  ;;  %v47_v3 = vld [vmem:[%s908_s1] sm:$0xff]  ;;  %v570_v4 = vpack.c.bf16 %v50_v2, %v48_v1  ;;  %v49_v5 = vld [vmem:[%s908_s1 + $0x10] sm:$0xff]  ;;  %v52_v6 = vld [vmem:[%s908_s1 + $0x28] sm:$0xff]  ;;  %vm689_vm1 = vmmov 0  }
  0x14   :  { %v54_v7 = vld [vmem:[%s908_s1 + $0x38] sm:$0xff]  ;;  %v572_v8 = vpack.c.bf16 %v49_v5, %v47_v3  ;;  %v51_v10 = vld [vmem:[%s908_s1 + $0x20] sm:$0xff]  ;;  %v53_v11 = vld [vmem:[%s908_s1 + $0x30] sm:$0xff] }
  0x15   :  { %v574_v9 = vpack.c.bf16 %v54_v7, %v52_v6  ;;  %v56_v12 = vld [vmem:[%s908_s1 + $0x48] sm:$0xff]  ;;  %571 = vmatprep.subr.bf16.mxu0 %v570_v4  ;;  %v58_v13 = vld [vmem:[%s908_s1 + $0x58] sm:$0xff]  ;;  %v576_v14 = vpack.c.bf16 %v53_v11, %v51_v10  ;;  %v55_v15 = vld [vmem:[%s908_s1 + $0x40] sm:$0xff] }
  0x16   :  { %573 = vmatpush1.bf16.msra.mxu0 %v572_v8  ;;  %v57_v16 = vld [vmem:[%s908_s1 + $0x50] sm:$0xff]  ;;  %v578_v17 = vpack.c.bf16 %v58_v13, %v56_v12  ;;  %v60_v18 = vld [vmem:[%s908_s1 + $0x68] sm:$0xff]  ;;  %v62_v19 = vld [vmem:[%s908_s1 + $0x78] sm:$0xff] }
  0x17   :  { %575 = vmatprep.subr.bf16.mxu0 %v574_v9  ;;  %v168_v20 = vld [vmem:[#allocation2 + $0x80] sm:$0xff]  ;;  %v169_v21 = vld [vmem:[#allocation2 + $0x88] sm:$0xff]  ;;  %v170_v26 = vld [vmem:[#allocation2 + $0x90] sm:$0xff]  ;;  %v580_v29 = vpack.c.bf16 %v57_v16, %v55_v15  ;;  %v582_v34 = vpack.c.bf16 %v62_v19, %v60_v18 }
  0x18   :  { %v152_v22 = vld [vmem:[#allocation2] sm:$0xff]  ;;  %v153_v23 = vld [vmem:[#allocation2 + $0x8] sm:$0xff]  ;;  %v586_v24 = vpack.c.bf16 %v169_v21, %v168_v20  ;;  %v171_v27 = vld [vmem:[#allocation2 + $0x98] sm:$0xff] }
  0x19   :  { %v588_v25 = vpack.c.bf16 %v153_v23, %v152_v22  ;;  %v154_v28 = vld [vmem:[#allocation2 + $0x10] sm:$0xff]  ;;  %v590_v30 = vpack.c.bf16 %v171_v27, %v170_v26  ;;  %v155_v31 = vld [vmem:[#allocation2 + $0x18] sm:$0xff]  ;;  %v172_v32 = vld [vmem:[#allocation2 + $0xa0] sm:$0xff] }
  0x1a   :  { %577 = vmatpush1.bf16.msra.mxu0 %v576_v14  ;;  %v173_v33 = vld [vmem:[#allocation2 + $0xa8] sm:$0xff]  ;;  %v59_v35 = vld [vmem:[%s908_s1 + $0x60] sm:$0xff]  ;;  %v61_v36 = vld [vmem:[%s908_s1 + $0x70] sm:$0xff]  ;;  %587 = vmatprep.subr.bf16.mxu1 %v586_v24  ;;  %v592_v37 = vpack.c.bf16 %v155_v31, %v154_v28  ;;  %v688_v14 = vmov 0.0|0.0  }
  0x1b   :  { %579 = vmatprep.subr.bf16.mxu0 %v578_v17  ;;  %589 = vmatpush3.bf16.msra.mxu1 %v588_v25  ;;  %v594_v38 = vpack.c.bf16 %v173_v33, %v172_v32  ;;  %v156_v39 = vld [vmem:[#allocation2 + $0x20] sm:$0xff]  ;;  %v157_v40 = vld [vmem:[#allocation2 + $0x28] sm:$0xff]  ;;  %v584_v41 = vpack.c.bf16 %v61_v36, %v59_v35  ;;  %v174_v42 = vld [vmem:[#allocation2 + $0xb0] sm:$0xff] }
  0x1c   :  { %591 = vmatprep.subr.bf16.mxu1 %v590_v30  ;;  %v175_v43 = vld [vmem:[#allocation2 + $0xb8] sm:$0xff]  ;;  %v596_v44 = vpack.c.bf16 %v157_v40, %v156_v39  ;;  %v158_v46 = vld [vmem:[#allocation2 + $0x30] sm:$0xff]  ;;  %v46_v48 = vld [vmem:[%s907_s0] sm:$0xff]  ;;  %v65_v30 = vlaneseq }
  0x1d   :  { %v598_v45 = vpack.c.bf16 %v175_v43, %v174_v42  ;;  %v159_v47 = vld [vmem:[#allocation2 + $0x38] sm:$0xff]  ;;  %v176_v49 = vld [vmem:[#allocation2 + $0xc0] sm:$0xff]  ;;  %v177_v50 = vld [vmem:[#allocation2 + $0xc8] sm:$0xff] }
  0x1e   :  { %581 = vmatpush1.bf16.msra.mxu0 %v580_v29  ;;  %v600_v51 = vpack.c.bf16 %v159_v47, %v158_v46  ;;  %v602_v52 = vpack.c.bf16 %v177_v50, %v176_v49  ;;  %v160_v53 = vld [vmem:[#allocation2 + $0x40] sm:$0xff]  ;;  %v161_v54 = vld [vmem:[#allocation2 + $0x48] sm:$0xff]  ;;  %v178_v55 = vld [vmem:[#allocation2 + $0xd0] sm:$0xff]  ;;  %v66_v31 = vshrl.u32 %v65_v30, 7 }
  0x1f   :  { %583 = vmatprep.subr.bf16.mxu0 %v582_v34  ;;  %593 = vmatpush3.bf16.msra.mxu1 %v592_v37  ;;  %v179_v56 = vld [vmem:[#allocation2 + $0xd8] sm:$0xff]  ;;  %v604_v57 = vpack.c.bf16 %v161_v54, %v160_v53  ;;  %v162_v59 = vld [vmem:[#allocation2 + $0x50] sm:$0xff]  ;;  %v180_v61 = vld [vmem:[#allocation2 + $0xe0] sm:$0xff] }
  0x20   :  { %595 = vmatprep.subr.bf16.mxu1 %v594_v38  ;;  %v606_v58 = vpack.c.bf16 %v179_v56, %v178_v55  ;;  %v163_v60 = vld [vmem:[#allocation2 + $0x58] sm:$0xff]  ;;  %v181_v62 = vld [vmem:[#allocation2 + $0xe8] sm:$0xff]  ;;  %v164_v2 = vld [vmem:[#allocation2 + $0x60] sm:$0xff]  ;;  %v67_v32 = vsub.s32 0, %v66_v31  ;;  %v71_v34 = vsub.s32 1, %v66_v31 }
  0x21   :  { %v608_v63 = vpack.c.bf16 %v163_v60, %v162_v59  ;;  %v610_v1 = vpack.c.bf16 %v181_v62, %v180_v61  ;;  %v165_v3 = vld [vmem:[#allocation2 + $0x68] sm:$0xff]  ;;  %v182_v5 = vld [vmem:[#allocation2 + $0xf0] sm:$0xff]  ;;  %v183_v6 = vld [vmem:[#allocation2 + $0xf8] sm:$0xff] }
  0x22   :  { %585 = vmatpush1.bf16.msra.mxu0 %v584_v41  ;;  %v612_v4 = vpack.c.bf16 %v165_v3, %v164_v2  ;;  %v614_v7 = vpack.c.bf16 %v183_v6, %v182_v5  ;;  %v166_v8 = vld [vmem:[#allocation2 + $0x70] sm:$0xff]  ;;  %v167_v9 = vld [vmem:[#allocation2 + $0x78] sm:$0xff]  ;;  %v262_v11 = vld [vmem:[%s912_s5] sm:$0xff] }
  0x23   :  { %597 = vmatpush3.bf16.msra.mxu1 %v596_v44  ;;  %v616_v10 = vpack.c.bf16 %v167_v9, %v166_v8  ;;  %v263_v12 = vld [vmem:[%s912_s5 + $0x8] sm:$0xff]  ;;  %v264_v13 = vld [vmem:[%s912_s5 + $0x10] sm:$0xff]  ;;  %618 = vmatprep.subr.bf16.mxu0 %v688_v14  ;;  %v265_v16 = vld [vmem:[%s912_s5 + $0x18] sm:$0xff] }
  0x24   :  { %599 = vmatprep.subr.bf16.mxu1 %v598_v45  ;;  %v619_v15 = vpack.c.bf16 %v263_v12, %v262_v11  ;;  %v622_v17 = vpack.c.bf16 %v265_v16, %v264_v13  ;;  %v266_v18 = vld [vmem:[%s912_s5 + $0x20] sm:$0xff]  ;;  %v267_v19 = vld [vmem:[%s912_s5 + $0x28] sm:$0xff]  ;;  %v268_v21 = vld [vmem:[%s912_s5 + $0x30] sm:$0xff] }
  0x25   :  { %450 = vmatmul.mubr.msk.f32.vlgmr.msra.gmra.mrb[0].mxu0 %vm75_vm0, %v46_v48  ;;  %v625_v20 = vpack.c.bf16 %v267_v19, %v266_v18  ;;  %v269_v22 = vld [vmem:[%s912_s5 + $0x38] sm:$0xff]  ;;  %v270_v24 = vld [vmem:[%s912_s5 + $0x40] sm:$0xff]  ;;  %v271_v25 = vld [vmem:[%s912_s5 + $0x48] sm:$0xff] }
  0x26   :  { %620 = vmatpush3.bf16.msra.mxu0 %v619_v15  ;;  %v628_v23 = vpack.c.bf16 %v269_v22, %v268_v21  ;;  %v631_v26 = vpack.c.bf16 %v271_v25, %v270_v24  ;;  %v272_v27 = vld [vmem:[%s912_s5 + $0x50] sm:$0xff]  ;;  %v273_v28 = vld [vmem:[%s912_s5 + $0x58] sm:$0xff]  ;;  %v63_v33 = vld [vmem:[%s909_s2] sm:$0x3]  ;;  %548 = vmatprep.mubr.msk.f32.mxu0 %vm689_vm1, %v687_v0 }
  0x27   :  { %601 = vmatpush3.bf16.msra.mxu1 %v600_v51  ;;  %621 = vmatprep.subr.bf16.mxu0 %v688_v14  ;;  %v634_v29 = vpack.c.bf16 %v273_v28, %v272_v27  ;;  %v68_v35 = vrot.slane %v63_v33, %v67_v32  ;;  %v72_v36 = vrot.slane %v63_v33, %v71_v34  ;;  %v274_v43 = vld [vmem:[%s912_s5 + $0x60] sm:$0xff]  ;;  %v275_v44 = vld [vmem:[%s912_s5 + $0x68] sm:$0xff]  ;;  %v276_v46 = vld [vmem:[%s912_s5 + $0x70] sm:$0xff] }
  0x28   :  { %603 = vmatprep.subr.bf16.mxu1 %v602_v52  ;;  %v637_v45 = vpack.c.bf16 %v275_v44, %v274_v43  ;;  %v277_v47 = vld [vmem:[%s912_s5 + $0x78] sm:$0xff]  ;;  %v356_v49 = vld [vmem:[%s914_s7] sm:$0xff]  ;;  %v357_v50 = vld [vmem:[%s914_s7 + $0x8] sm:$0xff] }
  0x29   :  { %v640_v48 = vpack.c.bf16 %v277_v47, %v276_v46  ;;  %v358_v51 = vld [vmem:[%s914_s7 + $0x10] sm:$0xff]  ;;  %v643_v52 = vpack.c.bf16 %v357_v50, %v356_v49  ;;  %v359_v53 = vld [vmem:[%s914_s7 + $0x18] sm:$0xff]  ;;  %v361_v55 = vld [vmem:[%s914_s7 + $0x28] sm:$0xff] }
  0x2a   :  { %623 = vmatpush3.bf16.msra.mxu0 %v622_v17  ;;  %v646_v54 = vpack.c.bf16 %v359_v53, %v358_v51  ;;  %v452_v3 = vld [vmem:[%s913_s6] ss:$0 sm:$0xff] }
  0x2b   :  { %605 = vmatpush3.bf16.msra.mxu1 %v604_v57  ;;  %624 = vmatprep.subr.bf16.mxu0 %v688_v14  ;;  %v453_v8 = vld [vmem:[%s915_s8] ss:$0 sm:$0xff] }
  0x2c   :  { %607 = vmatprep.subr.bf16.mxu1 %v606_v58  ;;  %v451_v58 = vld [vmem:[%s911_s4] ss:$0 sm:$0xff] }
  0x2e   :  { %626 = vmatpush3.bf16.msra.mxu0 %v625_v20 }
  0x2f   :  { %609 = vmatpush3.bf16.msra.mxu1 %v608_v63  ;;  %627 = vmatprep.subr.bf16.mxu0 %v688_v14  ;;  %v362_v63 = vld [vmem:[%s914_s7 + $0x30] sm:$0xff] }
  0x30   :  { %611 = vmatprep.subr.bf16.mxu1 %v610_v1  ;;  %v363_v1 = vld [vmem:[%s914_s7 + $0x38] sm:$0xff] }
  0x31   :  { %v652_v2 = vpack.c.bf16 %v363_v1, %v362_v63 }
  0x32   :  { %629 = vmatpush3.bf16.msra.mxu0 %v628_v23 }
  0x33   :  { %613 = vmatpush3.bf16.msra.mxu1 %v612_v4  ;;  %630 = vmatprep.subr.bf16.mxu0 %v688_v14 }
  0x34   :  { %615 = vmatprep.subr.bf16.mxu1 %v614_v7 }
  0x36   :  { %632 = vmatpush3.bf16.msra.mxu0 %v631_v26 }
  0x37   :  { %617 = vmatpush3.bf16.msra.mxu1 %v616_v10  ;;  %633 = vmatprep.subr.bf16.mxu0 %v688_v14 }
  0x38   :  { %642 = vmatprep.subr.bf16.mxu1 %v688_v14 }
  0x3a   :  { %635 = vmatpush3.bf16.msra.mxu0 %v634_v29 }
  0x3b   :  { %636 = vmatprep.subr.bf16.mxu0 %v688_v14 }
  0x3e   :  { %638 = vmatpush3.bf16.msra.mxu0 %v637_v45 }
  0x3f   :  { %639 = vmatprep.subr.bf16.mxu0 %v688_v14 }
  0x42   :  { %641 = vmatpush3.bf16.msra.mxu0 %v640_v48 }
  0xf8   :  { %v145_v37 = vpop.f32.mrb[0].mxu0 }
  0xf9   :  { %v146_v38 = vadd.f32 %v145_v37, %v68_v35  ;;  %v147_v39 = vpop.f32.mrb[1].mxu0 }
  0xfa   :  { %v148_v40 = vadd.f32 %v147_v39, %v72_v36 }
  0xfb   :  { %v150_v42 = vmax.f32 %v146_v38, 0.0 }
  0xfc   :  { %v151_v41 = vmax.f32 %v148_v40, 0.0 }
  0xfe   :  { %255 = vmatprep.mubr.f32.mxu1 %v151_v41 }
  0xff   :  { %256 = vmatmul.mubr.f32.vlgmr.msra.gmra.mrb[0].mxu1 %v150_v42 }
 0x100   :  { %567 = vmatprep.mubr.msk.f32.mxu1 %vm689_vm1, %v687_v0  ;;  %644 = vmatpush3.bf16.msra.mxu1 %v643_v52  ;;  %v360_v0 = vld [vmem:[%s914_s7 + $0x20] sm:$0xff] }
 0x101   :  { %645 = vmatprep.subr.bf16.mxu1 %v688_v14  ;;  %v649_v56 = vpack.c.bf16 %v361_v55, %v360_v0 }
 0x104   :  { %647 = vmatpush3.bf16.msra.mxu1 %v646_v54 }
 0x105   :  { %648 = vmatprep.subr.bf16.mxu1 %v688_v14 }
 0x108   :  { %650 = vmatpush3.bf16.msra.mxu1 %v649_v56 }
 0x109   :  { %651 = vmatprep.subr.bf16.mxu1 %v688_v14 }
 0x10c   :  { %653 = vmatpush3.bf16.msra.mxu1 %v652_v2 }
 0x1d2   :  { %v487_v57 = vpop.f32.mrb[0].mxu1 }
 0x1d3   :  { %v488_v59 = vpop.f32.mrb[1].mxu1 }
 0x1d4   :  { %v489_v60 = vadd.f32 %v488_v59, %v487_v57 }
 0x1d6   :  { %v258_v61 = vadd.f32 %v489_v60, %v451_v58 }
 0x1d8   :  { %v261_v62 = vmax.f32 %v258_v61, 0.0 }
 0x1da   :  { %549 = vmatmul.mubr.f32.vlgmr.msra.gmra.mrb[2].mxu0 %v261_v62 }
 0x2ad   :  { %v351_v4 = vpop.f32.mrb[2].mxu0 }
 0x2ae   :  { %v352_v5 = vadd.f32 %v452_v3, %v351_v4  ;;  %v550_v6 = vpop.f32.mrb[3].mxu0 }
 0x2b0   :  { %v355_v7 = vmax.f32 %v352_v5, 0.0 }
 0x2b2   :  { %568 = vmatmul.mubr.msk.f32.vlgmr.msra.gmra.mrb[2].mxu1 %vm75_vm0, %v355_v7 }
 0x385   :  { %v440_v9 = vpop.f32.mrb[2].mxu1 }
 0x386   :  { %v441_v10 = vadd.f32 %v453_v8, %v440_v9  ;;  %v569_v11 = vpop.f32.mrb[3].mxu1 }
 0x388   :  { %444 = vst [vmem:[%s916_s9] sm:$0xff] %v441_v10 }
 0x389   :  { %449 = vsyncpa [#allocation3], 1 }

</bundles_post_ra>
